<compile_context>
chip_gen: v5e
topology: v5e:2x2
jax: 0.10.0
libtpu: 0.0.40
codegen_flags: <defaults>
</compile_context>

<pallas_src>
import math
import functools

import jax
import jax.numpy as jnp
from jax.experimental import pallas as pl
from jax.experimental.pallas import tpu as pltpu


# ----------------------------------------------------------------------------
# Fused Pallas kernel
# ----------------------------------------------------------------------------
def _decoder_fused_kernel(x_ref, cross_ref, wq_ref, wkv_ref,
                          ln_g_ref, ln_b_ref, w_out_ref, b_out_ref,
                          out_ref, attn_ref,
                          *, scale, eps, n_layers, batch, seq_q, seq_kv):
    B, L, S = batch, seq_q, seq_kv
    G = 2                                        # streams: 0 = freq, 1 = trend
    D = x_ref.shape[-1]

    x = x_ref[...].astype(jnp.float32)           # (G, B*L, D)
    cross = cross_ref[...].astype(jnp.float32)   # (G, B*S, D)

    def gproj(a, w):
        # (G, M, D) @ (G, D, E) -> (G, M, E), batched over the stream axis.
        return jnp.einsum('gmd,gde->gme', a, w,
                          preferred_element_type=jnp.float32)

    # ---- K/V hoist: one lane-dense matmul per stream for ALL layers --------
    # wkv (G, D, 2*n_layers*D); per layer i, lanes [2i*D:(2i+1)*D] = K weights,
    # [(2i+1)*D:(2i+2)*D] = V weights.
    kv = gproj(cross, wkv_ref[...].astype(jnp.float32))   # (G, B*S, 2*n_l*D)

    wq = wq_ref[...].astype(jnp.float32)         # (G, D, n_layers*D)

    attn_pieces = []
    for i in range(n_layers):
        q = gproj(x, wq[:, :, i * D:(i + 1) * D])            # (G, B*L, D)
        k = kv[..., (2 * i) * D:(2 * i + 1) * D]             # (G, B*S, D)
        v = kv[..., (2 * i + 1) * D:(2 * i + 2) * D]         # (G, B*S, D)

        # Merge (stream, batch) into one attention batch axis; the reshapes
        # split the sublane dim at a tile boundary (16 -> 2x8), i.e. free.
        qf = q.reshape(G * B, L, D)
        kf = k.reshape(G * B, S, D)
        vf = v.reshape(G * B, S, D)

        s = jnp.einsum('bld,bsd->bls', qf, kf,
                       preferred_element_type=jnp.float32) * scale
        s = s - jnp.max(s, axis=-1, keepdims=True)
        p = jnp.exp(s)
        denom = jnp.sum(p, axis=-1, keepdims=True)
        r = pl.reciprocal(denom, approx=True)        # EUP slot (otherwise idle)
        r = r * (2.0 - denom * r)                    # one Newton step
        p = p * r
        o = jnp.einsum('bls,bsd->bld', p, vf,
                       preferred_element_type=jnp.float32)   # (G*B, L, D)
        x = x + o.reshape(G, B * L, D)

        # Lane-dense attention writeback blocks: [freq_i | trend_i], S lanes each.
        attn_pieces.append(p[:B])                             # (B, L, S)
        attn_pieces.append(p[B:])                             # (B, L, S)

    attn_ref[...] = jnp.concatenate(attn_pieces, axis=-1).astype(attn_ref.dtype)

    # ---- per-stream LayerNorm ----------------------------------------------
    ln_g = ln_g_ref[...].astype(jnp.float32)[:, None, :]      # (G, 1, D)
    ln_b = ln_b_ref[...].astype(jnp.float32)[:, None, :]
    mu = jnp.mean(x, axis=-1, keepdims=True)
    var = jnp.mean(jnp.square(x - mu), axis=-1, keepdims=True)
    xn = (x - mu) * jax.lax.rsqrt(var + eps) * ln_g + ln_b    # (G, B*L, D)

    # ---- fused mlp_out . out_projection tail --------------------------------
    xs = xn[0] + xn[1]                                        # (B*L, D)
    y = jnp.dot(xs, w_out_ref[...].astype(jnp.float32),
                preferred_element_type=jnp.float32)
    y = y + b_out_ref[...].astype(jnp.float32)                # (B*L, C)
    out_ref[...] = y.reshape(B, L, -1).astype(out_ref.dtype)


# ----------------------------------------------------------------------------
# Decoder.forward equivalent
# ----------------------------------------------------------------------------
def decoder_forward(x, cross_freq, cross_trend, params,
                    x_mask=None, cross_mask=None):
    # TODO(synk): x_mask / cross_mask are accepted but unused (None in this
    # synthetic setup); a real mask would be added to the scores pre-softmax.
    x_freq, x_trend = x
    B, L, D = x_freq.shape
    S = cross_freq.shape[1]
    n_layers = len(params["attn_layers"])
    C = params["w_proj"].shape[1]

    # --- input staging: stream axis leading, rows flattened ------------------
    x_gb = jnp.stack([x_freq, x_trend], axis=0).reshape(2, B * L, D)
    cross_gb = jnp.stack([cross_freq, cross_trend], axis=0).reshape(2, B * S, D)

    # --- lane-dense weight slabs ---------------------------------------------
    # Q: (2, D, n_layers*D); per stream, layers packed along lanes.
    wq_slab = jnp.stack([
        jnp.concatenate([lp["wq_f"] for lp in params["attn_layers"]], axis=-1),
        jnp.concatenate([lp["wq_t"] for lp in params["attn_layers"]], axis=-1),
    ], axis=0)
    # K/V: (2, D, 2*n_layers*D) with per-layer [K_i | V_i] lane pairs.
    wkv_slab = jnp.stack([
        jnp.concatenate([w for lp in params["attn_layers"]
                         for w in (lp["wk_f"], lp["wv_f"])], axis=-1),
        jnp.concatenate([w for lp in params["attn_layers"]
                         for w in (lp["wk_t"], lp["wv_t"])], axis=-1),
    ], axis=0)

    ln_g = jnp.concatenate([params["ln_f_g"], params["ln_t_g"]], axis=0)  # (2,D)
    ln_b = jnp.concatenate([params["ln_f_b"], params["ln_t_b"]], axis=0)  # (2,D)

    # mlp_out . out_projection fused (no nonlinearity between them).
    w_out = params["w_mlp"] @ params["w_proj"]                      # (D, C)
    b_out = params["b_mlp"] @ params["w_proj"] + params["b_proj"]   # (1, C)

    kernel = functools.partial(
        _decoder_fused_kernel, scale=1.0 / math.sqrt(D), eps=1e-5,
        n_layers=n_layers, batch=B, seq_q=L, seq_kv=S)

    def im2(i): return (0, 0)
    def im3(i): return (0, 0, 0)

    out, attn_slab = pl.pallas_call(
        kernel,
        out_shape=(jax.ShapeDtypeStruct((B, L, C), x_freq.dtype),
                   jax.ShapeDtypeStruct((B, L, 2 * n_layers * S), jnp.float32)),
        grid=(1,),
        in_specs=[
            pl.BlockSpec((2, B * L, D), im3),             # stacked x (freq, trend)
            pl.BlockSpec((2, B * S, D), im3),             # stacked cross
            pl.BlockSpec((2, D, n_layers * D), im3),      # packed q weights
            pl.BlockSpec((2, D, 2 * n_layers * D), im3),  # packed k/v weights
            pl.BlockSpec((2, D), im2),                    # ln gamma (freq, trend)
            pl.BlockSpec((2, D), im2),                    # ln beta  (freq, trend)
            pl.BlockSpec((D, C), im2),                    # fused tail weight
            pl.BlockSpec((1, C), im2),                    # fused tail bias
        ],
        out_specs=(
            pl.BlockSpec((B, L, C), im3),
            pl.BlockSpec((B, L, 2 * n_layers * S), im3),
        ),
        compiler_params=pltpu.CompilerParams(
            dimension_semantics=("arbitrary",)),
    )(x_gb, cross_gb, wq_slab, wkv_slab, ln_g, ln_b, w_out, b_out)

    attn = [(attn_slab[..., (2 * i) * S:(2 * i + 1) * S],
             attn_slab[..., (2 * i + 1) * S:(2 * i + 2) * S])
            for i in range(n_layers)]
    return out, attn


# ----------------------------------------------------------------------------
# Pure-JAX reference (unfused; for correctness check)
# ----------------------------------------------------------------------------
def _ref_layer(x, cross, wq, wk, wv):
    D = x.shape[-1]
    q = jnp.einsum("bld,de->ble", x, wq)
    k = jnp.einsum("bsd,de->bse", cross, wk)
    v = jnp.einsum("bsd,de->bse", cross, wv)
    s = jnp.einsum("ble,bse->bls", q, k) / math.sqrt(D)
    p = jax.nn.softmax(s, axis=-1)
    return x + jnp.einsum("bls,bse->ble", p, v), p


def _ref_forward(x, cross_freq, cross_trend, params):
    x_freq, x_trend = x
    for lp in params["attn_layers"]:
        x_freq, _ = _ref_layer(x_freq, cross_freq, lp["wq_f"], lp["wk_f"], lp["wv_f"])
        x_trend, _ = _ref_layer(x_trend, cross_trend, lp["wq_t"], lp["wk_t"], lp["wv_t"])

    def ln(v, g, b):
        mu = jnp.mean(v, -1, keepdims=True)
        var = jnp.mean(jnp.square(v - mu), -1, keepdims=True)
        return (v - mu) * jax.lax.rsqrt(var + 1e-5) * g + b

    x_freq = ln(x_freq, params["ln_f_g"], params["ln_f_b"])
    x_trend = ln(x_trend, params["ln_t_g"], params["ln_t_b"])
    h = (x_freq + x_trend) @ params["w_mlp"] + params["b_mlp"]
    return h @ params["w_proj"] + params["b_proj"]


# ----------------------------------------------------------------------------
# Main
# ----------------------------------------------------------------------------
if __name__ == "__main__":
    B, L, S, D, C_OUT, N_LAYERS = 2, 8, 8, 32, 4, 2
    key = jax.random.PRNGKey(0)
    keys = iter(jax.random.split(key, 64))

    def init(shape, scale):
        return jax.random.normal(next(keys), shape, jnp.float32) * scale

    # Deterministic parameters (synthetic; not a checkpoint load).
    params = {
        "attn_layers": [
            {
                "wq_f": init((D, D), 1.0 / math.sqrt(D)),
                "wk_f": init((D, D), 1.0 / math.sqrt(D)),
                "wv_f": init((D, D), 1.0 / math.sqrt(D)),
                "wq_t": init((D, D), 1.0 / math.sqrt(D)),
                "wk_t": init((D, D), 1.0 / math.sqrt(D)),
                "wv_t": init((D, D), 1.0 / math.sqrt(D)),
            }
            for _ in range(N_LAYERS)
        ],
        "ln_f_g": jnp.ones((1, D), jnp.float32),
        "ln_f_b": jnp.zeros((1, D), jnp.float32),
        "ln_t_g": jnp.ones((1, D), jnp.float32),
        "ln_t_b": jnp.zeros((1, D), jnp.float32),
        "w_mlp": init((D, D), 1.0 / math.sqrt(D)),
        "b_mlp": init((1, D), 0.02),
        "w_proj": init((D, C_OUT), 1.0 / math.sqrt(D)),
        "b_proj": init((1, C_OUT), 0.02),
    }

    x_freq = jax.random.normal(next(keys), (B, L, D), jnp.float32)
    x_trend = jax.random.normal(next(keys), (B, L, D), jnp.float32)
    cross_freq = jax.random.normal(next(keys), (B, S, D), jnp.float32)
    cross_trend = jax.random.normal(next(keys), (B, S, D), jnp.float32)

    fwd = jax.jit(decoder_forward)
    out, attn = fwd((x_freq, x_trend), cross_freq, cross_trend, params)
    out = jax.block_until_ready(out)

    ref = _ref_forward((x_freq, x_trend), cross_freq, cross_trend, params)
    assert out.shape == (B, L, C_OUT)
    assert len(attn) == N_LAYERS and attn[0][0].shape == (B, L, S)
    assert jnp.allclose(out, ref, atol=1e-4, rtol=1e-4), "mismatch vs reference"

    # sanity: attention rows are proper distributions
    assert jnp.allclose(jnp.sum(attn[0][0], axis=-1), 1.0, atol=1e-4)
    assert jnp.allclose(jnp.sum(attn[-1][1], axis=-1), 1.0, atol=1e-4)

    print("KERNEL_OK")
</pallas_src>

<mosaic_0001>
module attributes {stable_mosaic.version = 11 : i64} {
  func.func @_decoder_fused_kernel(%arg0: i32, %arg1: memref<2x16x32xf32, #tpu.memory_space<vmem>>, %arg2: memref<2x16x32xf32, #tpu.memory_space<vmem>>, %arg3: memref<2x32x64xf32, #tpu.memory_space<vmem>>, %arg4: memref<2x32x128xf32, #tpu.memory_space<vmem>>, %arg5: memref<2x32xf32, #tpu.memory_space<vmem>>, %arg6: memref<2x32xf32, #tpu.memory_space<vmem>>, %arg7: memref<32x4xf32, #tpu.memory_space<vmem>>, %arg8: memref<1x4xf32, #tpu.memory_space<vmem>>, %arg9: memref<2x8x4xf32, #tpu.memory_space<vmem>>, %arg10: memref<2x8x32xf32, #tpu.memory_space<vmem>>) attributes {dimension_semantics = [#tpu.dimension_semantics<arbitrary>], iteration_bounds = array<i64: 1>, scalar_prefetch = 0 : i64, scratch_operands = 0 : i64, tpu.core_type = #tpu.core_type<tc>, window_params = [{pipeline_mode = #tpu.pipeline_mode<synchronous>, transform_indices = @transform_0, window_bounds = array<i64: 2, 16, 32>}, {pipeline_mode = #tpu.pipeline_mode<synchronous>, transform_indices = @transform_1, window_bounds = array<i64: 2, 16, 32>}, {pipeline_mode = #tpu.pipeline_mode<synchronous>, transform_indices = @transform_2, window_bounds = array<i64: 2, 32, 64>}, {pipeline_mode = #tpu.pipeline_mode<synchronous>, transform_indices = @transform_3, window_bounds = array<i64: 2, 32, 128>}, {pipeline_mode = #tpu.pipeline_mode<synchronous>, transform_indices = @transform_4, window_bounds = array<i64: 2, 32>}, {pipeline_mode = #tpu.pipeline_mode<synchronous>, transform_indices = @transform_5, window_bounds = array<i64: 2, 32>}, {pipeline_mode = #tpu.pipeline_mode<synchronous>, transform_indices = @transform_6, window_bounds = array<i64: 32, 4>}, {pipeline_mode = #tpu.pipeline_mode<synchronous>, transform_indices = @transform_7, window_bounds = array<i64: 1, 4>}, {pipeline_mode = #tpu.pipeline_mode<synchronous>, transform_indices = @transform_8, window_bounds = array<i64: 2, 8, 4>}, {pipeline_mode = #tpu.pipeline_mode<synchronous>, transform_indices = @transform_9, window_bounds = array<i64: 2, 8, 32>}]} {
    %c0 = arith.constant 0 : index
    %c0_0 = arith.constant 0 : index
    %c0_1 = arith.constant 0 : index
    %0 = vector.load %arg1[%c0, %c0_0, %c0_1] : memref<2x16x32xf32, #tpu.memory_space<vmem>>, vector<2x16x32xf32>
    %c0_2 = arith.constant 0 : index
    %c0_3 = arith.constant 0 : index
    %c0_4 = arith.constant 0 : index
    %1 = vector.load %arg2[%c0_2, %c0_3, %c0_4] : memref<2x16x32xf32, #tpu.memory_space<vmem>>, vector<2x16x32xf32>
    %c0_5 = arith.constant 0 : index
    %c0_6 = arith.constant 0 : index
    %c0_7 = arith.constant 0 : index
    %2 = vector.load %arg4[%c0_5, %c0_6, %c0_7] : memref<2x32x128xf32, #tpu.memory_space<vmem>>, vector<2x32x128xf32>
    "tpu.trace_start"() <{level = 10 : i32, message = "gmd,gde->gme"}> : () -> ()
    %cst = arith.constant dense<0.000000e+00> : vector<2x16x128xf32>
    %3 = tpu.matmul %1, %2, %cst {dimension_numbers = #tpu.dot_dimension_numbers<[2], [1], [1], [2], [0, 0, 0, 1, 1, 2], [0], [0]>} : vector<2x16x32xf32>, vector<2x32x128xf32>, vector<2x16x128xf32> -> vector<2x16x128xf32>
    "tpu.trace_stop"() : () -> ()
    %c0_8 = arith.constant 0 : index
    %c0_9 = arith.constant 0 : index
    %c0_10 = arith.constant 0 : index
    %4 = vector.load %arg3[%c0_8, %c0_9, %c0_10] : memref<2x32x64xf32, #tpu.memory_space<vmem>>, vector<2x32x64xf32>
    %5 = vector.extract_strided_slice %4 {offsets = [0, 0, 0], sizes = [2, 32, 32], strides = [1, 1, 1]} : vector<2x32x64xf32> to vector<2x32x32xf32>
    "tpu.trace_start"() <{level = 10 : i32, message = "gmd,gde->gme"}> : () -> ()
    %cst_11 = arith.constant dense<0.000000e+00> : vector<2x16x32xf32>
    %6 = tpu.matmul %0, %5, %cst_11 {dimension_numbers = #tpu.dot_dimension_numbers<[2], [1], [1], [2], [0, 0, 0, 1, 1, 2], [0], [0]>} : vector<2x16x32xf32>, vector<2x32x32xf32>, vector<2x16x32xf32> -> vector<2x16x32xf32>
    "tpu.trace_stop"() : () -> ()
    %7 = vector.extract_strided_slice %3 {offsets = [0, 0, 0], sizes = [2, 16, 32], strides = [1, 1, 1]} : vector<2x16x128xf32> to vector<2x16x32xf32>
    %8 = vector.extract_strided_slice %3 {offsets = [0, 0, 32], sizes = [2, 16, 32], strides = [1, 1, 1]} : vector<2x16x128xf32> to vector<2x16x32xf32>
    %9 = vector.shape_cast %6 : vector<2x16x32xf32> to vector<4x8x32xf32>
    %10 = vector.shape_cast %7 : vector<2x16x32xf32> to vector<4x8x32xf32>
    %11 = vector.shape_cast %8 : vector<2x16x32xf32> to vector<4x8x32xf32>
    "tpu.trace_start"() <{level = 10 : i32, message = "bld,bsd->bls"}> : () -> ()
    %cst_12 = arith.constant dense<0.000000e+00> : vector<4x8x8xf32>
    %12 = tpu.matmul %9, %10, %cst_12 {dimension_numbers = #tpu.dot_dimension_numbers<[2], [2], [1], [1], [0, 0, 0, 1, 1, 1], [0], [0]>} : vector<4x8x32xf32>, vector<4x8x32xf32>, vector<4x8x8xf32> -> vector<4x8x8xf32>
    "tpu.trace_stop"() : () -> ()
    %cst_13 = arith.constant 0.176776692 : f32
    %13 = vector.broadcast %cst_13 : f32 to vector<4x8x8xf32>
    %14 = arith.mulf %12, %13 : vector<4x8x8xf32>
    %cst_14 = arith.constant dense<0xFF800000> : vector<4x8xf32>
    %15 = vector.multi_reduction <maximumf>, %14, %cst_14 [2] : vector<4x8x8xf32> to vector<4x8xf32>
    %16 = vector.shape_cast %15 : vector<4x8xf32> to vector<4x8x1xf32>
    %17 = vector.broadcast %16 : vector<4x8x1xf32> to vector<4x8x8xf32>
    %18 = arith.subf %14, %17 : vector<4x8x8xf32>
    %19 = math.exp %18 : vector<4x8x8xf32>
    %cst_15 = arith.constant dense<0.000000e+00> : vector<4x8xf32>
    %20 = vector.multi_reduction <add>, %19, %cst_15 [2] : vector<4x8x8xf32> to vector<4x8xf32>
    %21 = vector.shape_cast %20 : vector<4x8xf32> to vector<4x8x1xf32>
    %22 = tpu.reciprocal %21 {approx = true} : vector<4x8x1xf32> -> vector<4x8x1xf32>
    %23 = arith.mulf %21, %22 : vector<4x8x1xf32>
    %cst_16 = arith.constant 2.000000e+00 : f32
    %24 = vector.broadcast %cst_16 : f32 to vector<4x8x1xf32>
    %25 = arith.subf %24, %23 : vector<4x8x1xf32>
    %26 = arith.mulf %22, %25 : vector<4x8x1xf32>
    %27 = vector.broadcast %26 : vector<4x8x1xf32> to vector<4x8x8xf32>
    %28 = arith.mulf %19, %27 : vector<4x8x8xf32>
    "tpu.trace_start"() <{level = 10 : i32, message = "bls,bsd->bld"}> : () -> ()
    %cst_17 = arith.constant dense<0.000000e+00> : vector<4x8x32xf32>
    %29 = tpu.matmul %28, %11, %cst_17 {dimension_numbers = #tpu.dot_dimension_numbers<[2], [1], [1], [2], [0, 0, 0, 1, 1, 2], [0], [0]>} : vector<4x8x8xf32>, vector<4x8x32xf32>, vector<4x8x32xf32> -> vector<4x8x32xf32>
    "tpu.trace_stop"() : () -> ()
    %30 = vector.shape_cast %29 : vector<4x8x32xf32> to vector<2x16x32xf32>
    %31 = arith.addf %0, %30 : vector<2x16x32xf32>
    %32 = vector.extract_strided_slice %28 {offsets = [0, 0, 0], sizes = [2, 8, 8], strides = [1, 1, 1]} : vector<4x8x8xf32> to vector<2x8x8xf32>
    %33 = vector.extract_strided_slice %28 {offsets = [2, 0, 0], sizes = [2, 8, 8], strides = [1, 1, 1]} : vector<4x8x8xf32> to vector<2x8x8xf32>
    %34 = vector.extract_strided_slice %4 {offsets = [0, 0, 32], sizes = [2, 32, 32], strides = [1, 1, 1]} : vector<2x32x64xf32> to vector<2x32x32xf32>
    "tpu.trace_start"() <{level = 10 : i32, message = "gmd,gde->gme"}> : () -> ()
    %cst_18 = arith.constant dense<0.000000e+00> : vector<2x16x32xf32>
    %35 = tpu.matmul %31, %34, %cst_18 {dimension_numbers = #tpu.dot_dimension_numbers<[2], [1], [1], [2], [0, 0, 0, 1, 1, 2], [0], [0]>} : vector<2x16x32xf32>, vector<2x32x32xf32>, vector<2x16x32xf32> -> vector<2x16x32xf32>
    "tpu.trace_stop"() : () -> ()
    %36 = vector.extract_strided_slice %3 {offsets = [0, 0, 64], sizes = [2, 16, 32], strides = [1, 1, 1]} : vector<2x16x128xf32> to vector<2x16x32xf32>
    %37 = vector.extract_strided_slice %3 {offsets = [0, 0, 96], sizes = [2, 16, 32], strides = [1, 1, 1]} : vector<2x16x128xf32> to vector<2x16x32xf32>
    %38 = vector.shape_cast %35 : vector<2x16x32xf32> to vector<4x8x32xf32>
    %39 = vector.shape_cast %36 : vector<2x16x32xf32> to vector<4x8x32xf32>
    %40 = vector.shape_cast %37 : vector<2x16x32xf32> to vector<4x8x32xf32>
    "tpu.trace_start"() <{level = 10 : i32, message = "bld,bsd->bls"}> : () -> ()
    %cst_19 = arith.constant dense<0.000000e+00> : vector<4x8x8xf32>
    %41 = tpu.matmul %38, %39, %cst_19 {dimension_numbers = #tpu.dot_dimension_numbers<[2], [2], [1], [1], [0, 0, 0, 1, 1, 1], [0], [0]>} : vector<4x8x32xf32>, vector<4x8x32xf32>, vector<4x8x8xf32> -> vector<4x8x8xf32>
    "tpu.trace_stop"() : () -> ()
    %cst_20 = arith.constant 0.176776692 : f32
    %42 = vector.broadcast %cst_20 : f32 to vector<4x8x8xf32>
    %43 = arith.mulf %41, %42 : vector<4x8x8xf32>
    %cst_21 = arith.constant dense<0xFF800000> : vector<4x8xf32>
    %44 = vector.multi_reduction <maximumf>, %43, %cst_21 [2] : vector<4x8x8xf32> to vector<4x8xf32>
    %45 = vector.shape_cast %44 : vector<4x8xf32> to vector<4x8x1xf32>
    %46 = vector.broadcast %45 : vector<4x8x1xf32> to vector<4x8x8xf32>
    %47 = arith.subf %43, %46 : vector<4x8x8xf32>
    %48 = math.exp %47 : vector<4x8x8xf32>
    %cst_22 = arith.constant dense<0.000000e+00> : vector<4x8xf32>
    %49 = vector.multi_reduction <add>, %48, %cst_22 [2] : vector<4x8x8xf32> to vector<4x8xf32>
    %50 = vector.shape_cast %49 : vector<4x8xf32> to vector<4x8x1xf32>
    %51 = tpu.reciprocal %50 {approx = true} : vector<4x8x1xf32> -> vector<4x8x1xf32>
    %52 = arith.mulf %50, %51 : vector<4x8x1xf32>
    %cst_23 = arith.constant 2.000000e+00 : f32
    %53 = vector.broadcast %cst_23 : f32 to vector<4x8x1xf32>
    %54 = arith.subf %53, %52 : vector<4x8x1xf32>
    %55 = arith.mulf %51, %54 : vector<4x8x1xf32>
    %56 = vector.broadcast %55 : vector<4x8x1xf32> to vector<4x8x8xf32>
    %57 = arith.mulf %48, %56 : vector<4x8x8xf32>
    "tpu.trace_start"() <{level = 10 : i32, message = "bls,bsd->bld"}> : () -> ()
    %cst_24 = arith.constant dense<0.000000e+00> : vector<4x8x32xf32>
    %58 = tpu.matmul %57, %40, %cst_24 {dimension_numbers = #tpu.dot_dimension_numbers<[2], [1], [1], [2], [0, 0, 0, 1, 1, 2], [0], [0]>} : vector<4x8x8xf32>, vector<4x8x32xf32>, vector<4x8x32xf32> -> vector<4x8x32xf32>
    "tpu.trace_stop"() : () -> ()
    %59 = vector.shape_cast %58 : vector<4x8x32xf32> to vector<2x16x32xf32>
    %60 = arith.addf %31, %59 : vector<2x16x32xf32>
    %61 = vector.extract_strided_slice %57 {offsets = [0, 0, 0], sizes = [2, 8, 8], strides = [1, 1, 1]} : vector<4x8x8xf32> to vector<2x8x8xf32>
    %62 = vector.extract_strided_slice %57 {offsets = [2, 0, 0], sizes = [2, 8, 8], strides = [1, 1, 1]} : vector<4x8x8xf32> to vector<2x8x8xf32>
    %63 = tpu.concatenate %32, %33, %61, %62 in 2 : vector<2x8x8xf32>, vector<2x8x8xf32>, vector<2x8x8xf32>, vector<2x8x8xf32> -> vector<2x8x32xf32>
    %c0_25 = arith.constant 0 : index
    %c0_26 = arith.constant 0 : index
    %c0_27 = arith.constant 0 : index
    %64 = vector.load %arg10[%c0_25, %c0_26, %c0_27] : memref<2x8x32xf32, #tpu.memory_space<vmem>>, vector<2x8x32xf32>
    tpu.vector_store %arg10[%c0_25, %c0_26, %c0_27], %63 {strides = array<i32>} : memref<2x8x32xf32, #tpu.memory_space<vmem>>, vector<2x8x32xf32>,
    %c0_28 = arith.constant 0 : index
    %c0_29 = arith.constant 0 : index
    %65 = vector.load %arg5[%c0_28, %c0_29] : memref<2x32xf32, #tpu.memory_space<vmem>>, vector<2x32xf32>
    %66 = vector.shape_cast %65 : vector<2x32xf32> to vector<2x1x32xf32>
    %c0_30 = arith.constant 0 : index
    %c0_31 = arith.constant 0 : index
    %67 = vector.load %arg6[%c0_30, %c0_31] : memref<2x32xf32, #tpu.memory_space<vmem>>, vector<2x32xf32>
    %68 = vector.shape_cast %67 : vector<2x32xf32> to vector<2x1x32xf32>
    %cst_32 = arith.constant dense<0.000000e+00> : vector<2x16xf32>
    %69 = vector.multi_reduction <add>, %60, %cst_32 [2] : vector<2x16x32xf32> to vector<2x16xf32>
    %70 = vector.shape_cast %69 : vector<2x16xf32> to vector<2x16x1xf32>
    %cst_33 = arith.constant 3.200000e+01 : f32
    %71 = vector.broadcast %cst_33 : f32 to vector<2x16x1xf32>
    %72 = arith.divf %70, %71 : vector<2x16x1xf32>
    %73 = vector.broadcast %72 : vector<2x16x1xf32> to vector<2x16x32xf32>
    %74 = arith.subf %60, %73 : vector<2x16x32xf32>
    %75 = arith.mulf %74, %74 : vector<2x16x32xf32>
    %cst_34 = arith.constant dense<0.000000e+00> : vector<2x16xf32>
    %76 = vector.multi_reduction <add>, %75, %cst_34 [2] : vector<2x16x32xf32> to vector<2x16xf32>
    %77 = vector.shape_cast %76 : vector<2x16xf32> to vector<2x16x1xf32>
    %cst_35 = arith.constant 3.200000e+01 : f32
    %78 = vector.broadcast %cst_35 : f32 to vector<2x16x1xf32>
    %79 = arith.divf %77, %78 : vector<2x16x1xf32>
    %80 = vector.broadcast %72 : vector<2x16x1xf32> to vector<2x16x32xf32>
    %81 = arith.subf %60, %80 : vector<2x16x32xf32>
    %cst_36 = arith.constant 9.99999974E-6 : f32
    %82 = vector.broadcast %cst_36 : f32 to vector<2x16x1xf32>
    %83 = arith.addf %79, %82 : vector<2x16x1xf32>
    %84 = math.rsqrt %83 : vector<2x16x1xf32>
    %85 = vector.broadcast %84 : vector<2x16x1xf32> to vector<2x16x32xf32>
    %86 = arith.mulf %81, %85 : vector<2x16x32xf32>
    %87 = vector.broadcast %66 : vector<2x1x32xf32> to vector<2x16x32xf32>
    %88 = arith.mulf %86, %87 : vector<2x16x32xf32>
    %89 = vector.broadcast %68 : vector<2x1x32xf32> to vector<2x16x32xf32>
    %90 = arith.addf %88, %89 : vector<2x16x32xf32>
    %91 = vector.extract_strided_slice %90 {offsets = [0, 0, 0], sizes = [1, 16, 32], strides = [1, 1, 1]} : vector<2x16x32xf32> to vector<1x16x32xf32>
    %92 = vector.shape_cast %91 : vector<1x16x32xf32> to vector<16x32xf32>
    %93 = vector.extract_strided_slice %90 {offsets = [1, 0, 0], sizes = [1, 16, 32], strides = [1, 1, 1]} : vector<2x16x32xf32> to vector<1x16x32xf32>
    %94 = vector.shape_cast %93 : vector<1x16x32xf32> to vector<16x32xf32>
    %95 = arith.addf %92, %94 : vector<16x32xf32>
    %c0_37 = arith.constant 0 : index
    %c0_38 = arith.constant 0 : index
    %96 = vector.load %arg7[%c0_37, %c0_38] : memref<32x4xf32, #tpu.memory_space<vmem>>, vector<32x4xf32>
    %cst_39 = arith.constant dense<0.000000e+00> : vector<16x4xf32>
    %97 = tpu.matmul %95, %96, %cst_39 {dimension_numbers = #tpu.dot_dimension_numbers<[1], [0], [0], [1], [0, 0, 1, 1], [], []>} : vector<16x32xf32>, vector<32x4xf32>, vector<16x4xf32> -> vector<16x4xf32>
    %c0_40 = arith.constant 0 : index
    %c0_41 = arith.constant 0 : index
    %98 = vector.load %arg8[%c0_40, %c0_41] : memref<1x4xf32, #tpu.memory_space<vmem>>, vector<1x4xf32>
    %99 = vector.broadcast %98 : vector<1x4xf32> to vector<16x4xf32>
    %100 = arith.addf %97, %99 : vector<16x4xf32>
    %101 = vector.shape_cast %100 : vector<16x4xf32> to vector<2x8x4xf32>
    %c0_42 = arith.constant 0 : index
    %c0_43 = arith.constant 0 : index
    %c0_44 = arith.constant 0 : index
    %102 = vector.load %arg9[%c0_42, %c0_43, %c0_44] : memref<2x8x4xf32, #tpu.memory_space<vmem>>, vector<2x8x4xf32>
    tpu.vector_store %arg9[%c0_42, %c0_43, %c0_44], %101 {strides = array<i32>} : memref<2x8x4xf32, #tpu.memory_space<vmem>>, vector<2x8x4xf32>,
    return
  }
  func.func @transform_0(%arg0: i32) -> (i32, i32, i32) {
    %c0_i32 = arith.constant 0 : i32
    %c0_i32_0 = arith.constant 0 : i32
    %c0_i32_1 = arith.constant 0 : i32
    %c0_i32_2 = arith.constant 0 : i32
    return %c0_i32, %c0_i32_0, %c0_i32_1 : i32, i32, i32
  }
  func.func @transform_1(%arg0: i32) -> (i32, i32, i32) {
    %c0_i32 = arith.constant 0 : i32
    %c0_i32_0 = arith.constant 0 : i32
    %c0_i32_1 = arith.constant 0 : i32
    %c0_i32_2 = arith.constant 0 : i32
    return %c0_i32, %c0_i32_0, %c0_i32_1 : i32, i32, i32
  }
  func.func @transform_2(%arg0: i32) -> (i32, i32, i32) {
    %c0_i32 = arith.constant 0 : i32
    %c0_i32_0 = arith.constant 0 : i32
    %c0_i32_1 = arith.constant 0 : i32
    %c0_i32_2 = arith.constant 0 : i32
    return %c0_i32, %c0_i32_0, %c0_i32_1 : i32, i32, i32
  }
  func.func @transform_3(%arg0: i32) -> (i32, i32, i32) {
    %c0_i32 = arith.constant 0 : i32
    %c0_i32_0 = arith.constant 0 : i32
    %c0_i32_1 = arith.constant 0 : i32
    %c0_i32_2 = arith.constant 0 : i32
    return %c0_i32, %c0_i32_0, %c0_i32_1 : i32, i32, i32
  }
  func.func @transform_4(%arg0: i32) -> (i32, i32) {
    %c0_i32 = arith.constant 0 : i32
    %c0_i32_0 = arith.constant 0 : i32
    %c0_i32_1 = arith.constant 0 : i32
    return %c0_i32, %c0_i32_0 : i32, i32
  }
  func.func @transform_5(%arg0: i32) -> (i32, i32) {
    %c0_i32 = arith.constant 0 : i32
    %c0_i32_0 = arith.constant 0 : i32
    %c0_i32_1 = arith.constant 0 : i32
    return %c0_i32, %c0_i32_0 : i32, i32
  }
  func.func @transform_6(%arg0: i32) -> (i32, i32) {
    %c0_i32 = arith.constant 0 : i32
    %c0_i32_0 = arith.constant 0 : i32
    %c0_i32_1 = arith.constant 0 : i32
    return %c0_i32, %c0_i32_0 : i32, i32
  }
  func.func @transform_7(%arg0: i32) -> (i32, i32) {
    %c0_i32 = arith.constant 0 : i32
    %c0_i32_0 = arith.constant 0 : i32
    %c0_i32_1 = arith.constant 0 : i32
    return %c0_i32, %c0_i32_0 : i32, i32
  }
  func.func @transform_8(%arg0: i32) -> (i32, i32, i32) {
    %c0_i32 = arith.constant 0 : i32
    %c0_i32_0 = arith.constant 0 : i32
    %c0_i32_1 = arith.constant 0 : i32
    %c0_i32_2 = arith.constant 0 : i32
    return %c0_i32, %c0_i32_0, %c0_i32_1 : i32, i32, i32
  }
  func.func @transform_9(%arg0: i32) -> (i32, i32, i32) {
    %c0_i32 = arith.constant 0 : i32
    %c0_i32_0 = arith.constant 0 : i32
    %c0_i32_1 = arith.constant 0 : i32
    %c0_i32_2 = arith.constant 0 : i32
    return %c0_i32, %c0_i32_0, %c0_i32_1 : i32, i32, i32
  }
}

</mosaic_0001>

<bundles_post_ra>
// kernel: decoder_forward.1
= control target key start
LH: loop header
LB: loop body
LE: loop exit
PB: predicated region body
PF: predicated region fallthrough
CT: control target
= control target key end

     0   :  { %vm47_vm0 = vcmask 261120   ;;  %vm280_vm1 = vcmask 64512   ;;  %s1135_s13 = smov 32   ;;  %s1137_s14 = smov 8   ;;  %vm834_vm15 = vcmask 195584   ;;  %s1527_s3 = inlined_call_operand.vmem [shape: f32[2,32,128], index: 3, kind: input, shape index: {}]   ;;  %s1528_s2 = inlined_call_operand.vmem [shape: f32[2,32,64], index: 2, kind: input, shape index: {}]   ;;  %s1529_s1 = inlined_call_operand.vmem [shape: f32[2,16,32], index: 1, kind: input, shape index: {}]   ;;  %s1530_s0 = inlined_call_operand.vmem [shape: f32[2,16,32], index: 0, kind: input, shape index: {}]   ;;  %s1531_s7 = inlined_call_operand.vmem [shape: f32[1,4], index: 7, kind: input, shape index: {}]   ;;  %s1532_s6 = inlined_call_operand.vmem [shape: f32[32,4], index: 6, kind: input, shape index: {}]   ;;  %s1533_s4 = inlined_call_operand.vmem [shape: f32[2,32], index: 4, kind: input, shape index: {}]   ;;  %s1534_s5 = inlined_call_operand.vmem [shape: f32[2,32], index: 5, kind: input, shape index: {}]   ;;  %s1535_s9 = inlined_call_operand.vmem [shape: f32[2,8,32], index: 9, kind: output, shape index: {1}]   ;;  %s1536_s8 = inlined_call_operand.vmem [shape: f32[2,8,4], index: 8, kind: output, shape index: {0}]  }
   0x1   :  { %v42_v0 = vld [vmem:[%s1527_s3 + $0x18] sm:$0xff]  ;;  %v41_v2 = vld [vmem:[%s1527_s3 + $0x10] sm:$0xff]  ;;  %v40_v4 = vld [vmem:[%s1527_s3 + $0x8] sm:$0xff]  ;;  %s1138_s15 = smov 16   ;;  %s1139_s16 = smov 24  }
   0x2   :  { %v1196_v1 = vld [vmem:[%s1528_s2 + $0x18] sm:$0xff]  ;;  %1044 = vmatpush.msra.mxu1 %v42_v0  ;;  %v1205_v3 = vld [vmem:[%s1528_s2 + $0x10] sm:$0xff]  ;;  %66 = vmatpush.msra.mxu0 %v42_v0  ;;  %v1215_v6 = vld [vmem:[%s1528_s2 + $0x8] sm:$0xff] }
   0x3   :  { %132 = vmatpush.msra.mxu2 %v1196_v1  ;;  %v1065_v5 = vpack.i.bf16 %v1205_v3, %v1196_v1  ;;  %v1220_v7 = vld [vmem:[%s1528_s2 + $0x38] sm:$0xff]  ;;  %v1225_v8 = vld [vmem:[%s1528_s2] sm:$0xff]  ;;  %v1233_v10 = vld [vmem:[%s1528_s2 + $0x30] sm:$0xff] }
   0x4   :  { %1045 = vmatpush.msra.mxu1 %v41_v2  ;;  %v1070_v9 = vpack.i.bf16 %v1225_v8, %v1215_v6  ;;  %67 = vmatpush.msra.mxu0 %v41_v2  ;;  %v39_v11 = vld [vmem:[%s1527_s3] sm:$0xff]  ;;  %v36_v12 = vld [vmem:[%s1529_s1 + $0x8] sm:$0xff]  ;;  %v1075_v13 = vpack.i.bf16 %v1233_v10, %v1220_v7  ;;  %v46_v17 = vld [vmem:[%s1527_s3 + $0x38] sm:$0xff] }
   0x5   :  { %133 = vmatpush.msra.mxu2 %v1205_v3  ;;  %161 = vmatpush.msra.mxu3 %v1220_v7  ;;  %v1248_v14 = vld [vmem:[%s1530_s0] sm:$0xff]  ;;  %v1253_v15 = vld [vmem:[%s1528_s2 + $0x28] sm:$0xff]  ;;  %v45_v20 = vld [vmem:[%s1527_s3 + $0x30] sm:$0xff] }
   0x6   :  { %1046 = vmatpush.msra.mxu1 %v40_v4  ;;  %v1258_v16 = vld [vmem:[%s1528_s2 + $0x20] sm:$0xff]  ;;  %68 = vmatpush.msra.mxu0 %v40_v4  ;;  %v44_v21 = vld [vmem:[%s1527_s3 + $0x28] sm:$0xff]  ;;  %v1284_v22 = vld [vmem:[%s1530_s0 + $0x10] sm:$0xff] }
   0x7   :  { %134 = vmatpush.msra.mxu2 %v1215_v6  ;;  %162 = vmatpush.msra.mxu3 %v1233_v10  ;;  %v1080_v18 = vpack.i.bf16 %v1258_v16, %v1253_v15  ;;  %v35_v19 = vld [vmem:[%s1529_s1] sm:$0xff]  ;;  %v37_v24 = vld [vmem:[%s1529_s1 + $0x10] sm:$0xff]  ;;  %v1298_v25 = vld [vmem:[%s1530_s0 + $0x8] sm:$0xff] }
   0x8   :  { %1047 = vmatpush.msra.mxu1 %v39_v11  ;;  %69 = vmatpush.msra.mxu0 %v39_v11  ;;  %v43_v23 = vld [vmem:[%s1527_s3 + $0x20] sm:$0xff]  ;;  %v1306_v26 = vld [vmem:[%s1530_s0 + $0x18] sm:$0xff]  ;;  %s1133_s0 = smov 96  }
   0x9   :  { %135 = vmatpush.msra.mxu2 %v1225_v8  ;;  %1007 = vmatmul.msk.f32.vlgmr.msra.gmra.mxu1 %vm47_vm0, %v36_v12  ;;  %v38_v27 = vld [vmem:[%s1529_s1 + $0x18] sm:$0xff]  ;;  %s1134_s1 = smov 64  }
   0xa   :  { %1010 = vmatmul.msk.f32.vlgmr.msra.gmra.mxu2 %vm47_vm0, %v1248_v14  ;;  %95 = vmatpush.msrb.mxu1 %v46_v17 }
   0xb   :  { %163 = vmatpush.msra.mxu3 %v1253_v15  ;;  %1006 = vmatmul.msk.f32.vlgmr.msra.gmra.mxu0 %vm47_vm0, %v35_v19 }
   0xc   :  { %96 = vmatpush.msrb.mxu1 %v45_v20 }
   0xd   :  { %164 = vmatpush.msra.mxu3 %v1258_v16 }
   0xe   :  { %97 = vmatpush.msrb.mxu1 %v44_v21  ;;  %1012 = vmatmul.msk.f32.vlgmr.msra.gmra.mxu3 %vm47_vm0, %v1284_v22 }
  0x10   :  { %98 = vmatpush.msrb.mxu1 %v43_v23 }
  0x11   :  { %1008 = vmatmul.msk.f32.vlgmr.msrb.gmra.mxu1 %vm47_vm0, %v37_v24 }
  0x12   :  { %1011 = vmatmul.msk.f32.gmra.mxu2 %vm47_vm0, %v1298_v25 }
  0x16   :  { %1013 = vmatmul.msk.f32.gmra.mxu3 %vm47_vm0, %v1306_v26 }
  0x19   :  { %1009 = vmatmul.msk.f32.gmra.mxu1 %vm47_vm0, %v38_v27 }
  0x86   :  { %v1314_v28 = vpop.f32.mrf.mxu1 }
  0x87   :  { %1016 = vmatpush.xpose.msk.msra.mxu1 %vm47_vm0, %v1314_v28 }
  0x88   :  { %v1318_v29 = vpop.f32.mrf.mxu0 }
  0x89   :  { %1014 = vmatpush.xpose.msk.msrb.mxu0 %vm47_vm0, %v1318_v29 }
  0x8d   :  { %v137_v30 = vpop.f32.mrf.mxu2 }
  0x8e   :  { %1015 = vmatmul.msk.f32.vlgmr.msrb.gmra.mxu0 %vm47_vm0, %v137_v30  ;;  %v1323_v31 = vpop.f32.mrf.mxu1 }
  0x8f   :  { %1018 = vmatpush.xpose.msk.msrb.mxu2 %vm47_vm0, %v1323_v31  ;;  %v1055_v17 = vpack.i.bf16 %v1323_v31, %v1318_v29 }
  0x91   :  { %v166_v32 = vpop.f32.mrf.mxu3 }
  0x92   :  { %1019 = vmatmul.msk.f32.vlgmr.msrb.gmra.mxu2 %vm47_vm0, %v166_v32 }
  0x95   :  { %v140_v33 = vpop.f32.mrf.mxu2 }
  0x96   :  { %1017 = vmatmul.msk.f32.vlgmr.msra.gmra.mxu1 %vm47_vm0, %v140_v33  ;;  %v1329_v34 = vpop.f32.mrf.mxu1 }
  0x97   :  { %1020 = vmatpush.xpose.msk.msrb.mxu3 %vm47_vm0, %v1329_v34  ;;  %v1060_v12 = vpack.i.bf16 %v1329_v34, %v1314_v28 }
  0x99   :  { %v169_v35 = vpop.f32.mrf.mxu3 }
  0x9a   :  { %1021 = vmatmul.msk.f32.vlgmr.msrb.gmra.mxu3 %vm47_vm0, %v169_v35 }
 0x10b   :  { %v195_v36 = vpop.f32.mrf.mxu0 }
 0x10c   :  { %v276_v37 = vmul.f32 0.17677669, %v195_v36 }
 0x10e   :  { %v281_v38 = vsel %vm280_vm1, %v276_v37, -inf }
 0x10f   :  { %282 = vmax.xlane.f32.xlu0 %v281_v38 }
 0x113   :  { %v221_v39 = vpop.f32.mrf.mxu1 }
 0x114   :  { %v277_v40 = vmul.f32 0.17677669, %v221_v39 }
 0x115   :  { %v247_v41 = vpop.f32.mrf.mxu2 }
 0x116   :  { %v284_v42 = vsel %vm280_vm1, %v277_v40, -inf  ;;  %v278_v43 = vmul.f32 0.17677669, %v247_v41 }
 0x117   :  { %285 = vmax.xlane.f32.xlu1 %v284_v42 }
 0x118   :  { %v287_v44 = vsel %vm280_vm1, %v278_v43, -inf }
 0x119   :  { %288 = vmax.xlane.f32.xlu0 %v287_v44 }
 0x11d   :  { %v273_v45 = vpop.f32.mrf.mxu3 }
 0x11e   :  { %v279_v46 = vmul.f32 0.17677669, %v273_v45 }
 0x120   :  { %v290_v47 = vsel %vm280_vm1, %v279_v46, -inf }
 0x121   :  { %291 = vmax.xlane.f32.xlu1 %v290_v47 }
 0x182   :  { %v283_v48 = vpop.xlane.xlu0 %282 }
 0x183   :  { %v293_v49 = vsub.f32 %v276_v37, %v283_v48 }
 0x185   :  { %v297_v50 = vmul.f32 1.442695, %v293_v49 }
 0x187   :  { %1091 = vpow2.f32 %v297_v50 }
 0x18a   :  { %v286_v51 = vpop.xlane.xlu1 %285 }
 0x18b   :  { %v294_v52 = vsub.f32 %v277_v40, %v286_v51 }
 0x18c   :  { %v289_v55 = vpop.xlane.xlu0 %288 }
 0x18d   :  { %v1092_v53 = vpop.eup %1091  ;;  %v299_v54 = vmul.f32 1.442695, %v294_v52  ;;  %v295_v56 = vsub.f32 %v278_v43, %v289_v55 }
 0x18e   :  { %v305_v57 = vsel %vm280_vm1, %v1092_v53, 0.0 }
 0x18f   :  { %1093 = vpow2.f32 %v299_v54  ;;  %306 = vadd.xlane.f32.xlu2 %v305_v57  ;;  %v301_v58 = vmul.f32 1.442695, %v295_v56 }
 0x191   :  { %1095 = vpow2.f32 %v301_v58 }
 0x194   :  { %v292_v60 = vpop.xlane.xlu1 %291 }
 0x195   :  { %v1094_v59 = vpop.eup %1093  ;;  %v296_v61 = vsub.f32 %v279_v46, %v292_v60 }
 0x196   :  { %v308_v62 = vsel %vm280_vm1, %v1094_v59, 0.0 }
 0x197   :  { %309 = vadd.xlane.f32.xlu0 %v308_v62  ;;  %v1096_v63 = vpop.eup %1095  ;;  %v303_v0 = vmul.f32 1.442695, %v296_v61 }
 0x198   :  { %v311_v2 = vsel %vm280_vm1, %v1096_v63, 0.0 }
 0x199   :  { %1097 = vpow2.f32 %v303_v0  ;;  %312 = vadd.xlane.f32.xlu2 %v311_v2 }
 0x19f   :  { %v1098_v4 = vpop.eup %1097 }
 0x1a0   :  { %v314_v11 = vsel %vm280_vm1, %v1098_v4, 0.0 }
 0x1a1   :  { %315 = vadd.xlane.f32.xlu1 %v314_v11 }
 0x1ab   :  { %1061 = vrot.lane.b32.xlu0 %v1060_v12, %s1133_s0 }
 0x1b1   :  { %1056 = vrot.lane.b32.xlu2 %v1055_v17, %s1133_s0 }
 0x1b3   :  { %1076 = vrot.lane.b32.xlu0 %v1075_v13, %s1133_s0 }
 0x1b9   :  { %1071 = vrot.lane.b32.xlu2 %v1070_v9, %s1133_s0 }
 0x1ba   :  { %1066 = vrot.lane.b32.xlu1 %v1065_v5, %s1133_s0 }
 0x1bb   :  { %562 = vrot.lane.b32.xlu0 %v1314_v28, %s1134_s1 }
 0x1c1   :  { %1081 = vrot.lane.b32.xlu2 %v1080_v18, %s1133_s0 }
 0x1c2   :  { %535 = vrot.lane.b32.xlu1 %v1318_v29, %s1134_s1 }
 0x1c9   :  { %589 = vrot.lane.b32.xlu2 %v1323_v31, %s1134_s1 }
 0x1ca   :  { %616 = vrot.lane.b32.xlu1 %v1329_v34, %s1134_s1 }
 0x202   :  { %v307_v7 = vpop.xlane.xlu2 %306 }
 0x203   :  { %1099 = vrcp.f32 %v307_v7 }
 0x209   :  { %v1100_v6 = vpop.eup %1099 }
 0x20a   :  { %v310_v8 = vpop.xlane.xlu0 %309  ;;  %v321_v9 = vmul.f32 %v1100_v6, %v307_v7 }
 0x20b   :  { %1101 = vrcp.f32 %v310_v8 }
 0x20c   :  { %v313_v10 = vpop.xlane.xlu2 %312  ;;  %v325_v1 = vsub.f32 2.0, %v321_v9 }
 0x20d   :  { %1103 = vrcp.f32 %v313_v10 }
 0x20e   :  { %v329_v5 = vmul.f32 %v1100_v6, %v325_v1 }
 0x210   :  { %v1362_v23 = vmul.f32 %v1092_v53, %v329_v5 }
 0x211   :  { %v1102_v3 = vpop.eup %1101 }
 0x212   :  { %v322_v13 = vmul.f32 %v1102_v3, %v310_v8 }
 0x213   :  { %v1104_v15 = vpop.eup %1103 }
 0x214   :  { %v323_v16 = vmul.f32 %v1104_v15, %v313_v10  ;;  %v1057_v18 = vpop.permute.xlu2 %1056  ;;  %v316_v19 = vpop.xlane.xlu1 %315  ;;  %v326_v24 = vsub.f32 2.0, %v322_v13 }
 0x215   :  { %v1059_v20 = vunpack.i.h.bf16 %v1057_v18  ;;  %v1058_v21 = vunpack.i.l.bf16 %v1057_v18  ;;  %1105 = vrcp.f32 %v316_v19 }
 0x216   :  { %v327_v27 = vsub.f32 2.0, %v323_v16  ;;  %v330_v32 = vmul.f32 %v1102_v3, %v326_v24 }
 0x217   :  { %358 = vmatpush.msra.mxu0 %v1058_v21  ;;  %410 = vmatpush.msra.mxu2 %v1059_v20 }
 0x218   :  { %v331_v30 = vmul.f32 %v1104_v15, %v327_v27  ;;  %1022 = vmatmul.msk.f32.vlgmr.msra.gmra.mxu0 %vm280_vm1, %v1362_v23  ;;  %v1370_v41 = vmul.f32 %v1094_v59, %v330_v32 }
 0x21a   :  { %v1366_v33 = vmul.f32 %v1096_v63, %v331_v30 }
 0x21b   :  { %v1106_v35 = vpop.eup %1105 }
 0x21c   :  { %v324_v36 = vmul.f32 %v1106_v35, %v316_v19  ;;  %v1072_v37 = vpop.permute.xlu2 %1071  ;;  %1024 = vmatmul.msk.f32.vlgmr.msra.gmra.mxu2 %vm280_vm1, %v1366_v33 }
 0x21d   :  { %v1062_v38 = vpop.permute.xlu0 %1061  ;;  %v1073_v55 = vunpack.i.l.bf16 %v1072_v37  ;;  %v1074_v56 = vunpack.i.h.bf16 %v1072_v37 }
 0x21e   :  { %v1064_v39 = vunpack.i.h.bf16 %v1062_v38  ;;  %v1063_v40 = vunpack.i.l.bf16 %v1062_v38  ;;  %v328_v42 = vsub.f32 2.0, %v324_v36 }
 0x220   :  { %384 = vmatpush.msrb.mxu1 %v1063_v40  ;;  %436 = vmatpush.msra.mxu3 %v1064_v39  ;;  %v332_v43 = vmul.f32 %v1106_v35, %v328_v42 }
 0x221   :  { %1023 = vmatmul.msk.f32.vlgmr.msrb.gmra.mxu1 %vm280_vm1, %v1370_v41 }
 0x222   :  { %v1374_v44 = vmul.f32 %v1098_v4, %v332_v43 }
 0x224   :  { %1025 = vmatmul.msk.f32.vlgmr.msra.gmra.mxu3 %vm280_vm1, %v1374_v44  ;;  %v1082_v48 = vpop.permute.xlu2 %1081 }
 0x225   :  { %v1077_v45 = vpop.permute.xlu0 %1076  ;;  %v1083_v49 = vunpack.i.l.bf16 %v1082_v48  ;;  %v1084_v50 = vunpack.i.h.bf16 %v1082_v48  ;;  %v1085_v48 = vpack.i.bf16 %v1329_v34, %v1318_v29 }
 0x226   :  { %v1079_v46 = vunpack.i.h.bf16 %v1077_v45  ;;  %v1078_v47 = vunpack.i.l.bf16 %v1077_v45 }
 0x228   :  { %524 = vmatpush.msra.mxu1 %v1078_v47 }
 0x22a   :  { %525 = vmatpush.msra.mxu1 %v1079_v46 }
 0x22c   :  { %526 = vmatpush.msra.mxu1 %v1083_v49  ;;  %v1067_v52 = vpop.permute.xlu1 %1066  ;;  %v590_v58 = vpop.permute.xlu2 %589 }
 0x22d   :  { %v563_v51 = vpop.permute.xlu0 %562  ;;  %v1069_v53 = vunpack.i.h.bf16 %v1067_v52  ;;  %v1068_v54 = vunpack.i.l.bf16 %v1067_v52 }
 0x22e   :  { %1032 = vmatpush.xpose.msk.msrb.mxu3 %vm47_vm0, %v563_v51  ;;  %527 = vmatpush.msra.mxu1 %v1084_v50 }
 0x22f   :  { %479 = vmatpush.msrb.mxu0 %v1068_v54 }
 0x231   :  { %480 = vmatpush.msrb.mxu0 %v1069_v53 }
 0x233   :  { %481 = vmatpush.msrb.mxu0 %v1073_v55 }
 0x234   :  { %v536_v57 = vpop.permute.xlu1 %535 }
 0x235   :  { %1030 = vmatpush.xpose.msk.msrb.mxu2 %vm47_vm0, %v536_v57  ;;  %482 = vmatpush.msrb.mxu0 %v1074_v56 }
 0x239   :  { %1034 = vmatpush.xpose.msk.msra.mxu2 %vm47_vm0, %v590_v58 }
 0x23c   :  { %v617_v59 = vpop.permute.xlu1 %616 }
 0x23d   :  { %1036 = vmatpush.xpose.msk.msra.mxu3 %vm47_vm0, %v617_v59 }
 0x295   :  { %v360_v60 = vpop.f32.mrf.mxu0 }
 0x296   :  { %v1383_v61 = vadd.f32 %v360_v60, %v1248_v14 }
 0x298   :  { %1026 = vmatmul.msk.f32.vlgmr.msrb.gmra.mxu0 %vm47_vm0, %v1383_v61 }
 0x29e   :  { %v386_v62 = vpop.f32.mrf.mxu1 }
 0x29f   :  { %v1388_v63 = vadd.f32 %v386_v62, %v1298_v25  ;;  %v412_v0 = vpop.f32.mrf.mxu2 }
 0x2a0   :  { %v1391_v2 = vadd.f32 %v412_v0, %v1284_v22 }
 0x2a1   :  { %1027 = vmatmul.msk.f32.gmra.mxu0 %vm47_vm0, %v1388_v63 }
 0x2a2   :  { %1028 = vmatmul.msk.f32.vlgmr.msra.gmra.mxu1 %vm47_vm0, %v1391_v2 }
 0x2a7   :  { %v438_v4 = vpop.f32.mrf.mxu3 }
 0x2a8   :  { %v1398_v14 = vadd.f32 %v438_v4, %v1306_v26 }
 0x2aa   :  { %1029 = vmatmul.msk.f32.gmra.mxu1 %vm47_vm0, %v1398_v14 }
 0x315   :  { %v484_v11 = vpop.f32.mrf.mxu0 }
 0x316   :  { %1031 = vmatmul.msk.f32.vlgmr.msrb.gmra.mxu2 %vm47_vm0, %v484_v11 }
 0x31e   :  { %v487_v25 = vpop.f32.mrf.mxu0 }
 0x31f   :  { %1033 = vmatmul.msk.f32.vlgmr.msrb.gmra.mxu3 %vm47_vm0, %v487_v25  ;;  %v529_v22 = vpop.f32.mrf.mxu1 }
 0x320   :  { %1035 = vmatmul.msk.f32.vlgmr.msra.gmra.mxu2 %vm47_vm0, %v529_v22 }
 0x327   :  { %v532_v12 = vpop.f32.mrf.mxu1 }
 0x328   :  { %1037 = vmatmul.msk.f32.vlgmr.msra.gmra.mxu3 %vm47_vm0, %v532_v12 }
 0x399   :  { %v559_v17 = vpop.f32.mrf.mxu2 }
 0x39a   :  { %v643_v7 = vmul.f32 0.17677669, %v559_v17 }
 0x39c   :  { %v647_v26 = vsel %vm280_vm1, %v643_v7, -inf }
 0x39d   :  { %648 = vmax.xlane.f32.xlu2 %v647_v26 }
 0x3a2   :  { %v586_v6 = vpop.f32.mrf.mxu3 }
 0x3a3   :  { %v613_v8 = vpop.f32.mrf.mxu2  ;;  %v644_v1 = vmul.f32 0.17677669, %v586_v6 }
 0x3a4   :  { %v645_v9 = vmul.f32 0.17677669, %v613_v8 }
 0x3a5   :  { %v650_v13 = vsel %vm280_vm1, %v644_v1, -inf }
 0x3a6   :  { %v653_v10 = vsel %vm280_vm1, %v645_v9, -inf }
 0x3a7   :  { %654 = vmax.xlane.f32.xlu0 %v653_v10 }
 0x3ab   :  { %v640_v3 = vpop.f32.mrf.mxu3 }
 0x3ac   :  { %v646_v5 = vmul.f32 0.17677669, %v640_v3 }
 0x3ae   :  { %v656_v15 = vsel %vm280_vm1, %v646_v5, -inf }
 0x3af   :  { %651 = vmax.xlane.f32.xlu0 %v650_v13  ;;  %657 = vmax.xlane.f32.xlu1 %v656_v15 }
 0x410   :  { %v649_v16 = vpop.xlane.xlu2 %648 }
 0x411   :  { %v659_v18 = vsub.f32 %v643_v7, %v649_v16 }
 0x413   :  { %v663_v19 = vmul.f32 1.442695, %v659_v18 }
 0x415   :  { %1107 = vpow2.f32 %v663_v19 }
 0x41a   :  { %v655_v20 = vpop.xlane.xlu0 %654 }
 0x41b   :  { %v1108_v21 = vpop.eup %1107  ;;  %v661_v36 = vsub.f32 %v645_v9, %v655_v20 }
 0x41c   :  { %v671_v24 = vsel %vm280_vm1, %v1108_v21, 0.0 }
 0x41d   :  { %672 = vadd.xlane.f32.xlu1 %v671_v24  ;;  %v667_v39 = vmul.f32 1.442695, %v661_v36  ;;  %v1136_v24 = vmov 32.0  }
 0x422   :  { %v652_v27 = vpop.xlane.xlu0 %651  ;;  %v658_v30 = vpop.xlane.xlu1 %657 }
 0x423   :  { %v660_v32 = vsub.f32 %v644_v1, %v652_v27  ;;  %v662_v35 = vsub.f32 %v646_v5, %v658_v30 }
 0x425   :  { %v665_v37 = vmul.f32 1.442695, %v660_v32  ;;  %v669_v38 = vmul.f32 1.442695, %v662_v35 }
 0x427   :  { %1109 = vpow2.f32 %v665_v37 }
 0x428   :  { %1111 = vpow2.f32 %v669_v38 }
 0x429   :  { %1113 = vpow2.f32 %v667_v39 }
 0x42d   :  { %v1110_v40 = vpop.eup %1109 }
 0x42e   :  { %v1112_v42 = vpop.eup %1111  ;;  %v674_v43 = vsel %vm280_vm1, %v1110_v40, 0.0 }
 0x42f   :  { %675 = vadd.xlane.f32.xlu2 %v674_v43  ;;  %v680_v45 = vsel %vm280_vm1, %v1112_v42, 0.0  ;;  %v1114_v46 = vpop.eup %1113 }
 0x430   :  { %681 = vadd.xlane.f32.xlu0 %v680_v45  ;;  %v677_v47 = vsel %vm280_vm1, %v1114_v46, 0.0 }
 0x436   :  { %755 = vrot.lane.b32.xlu1 %v1323_v31, %s1135_s13 }
 0x437   :  { %678 = vadd.xlane.f32.xlu2 %v677_v47 }
 0x444   :  { %1086 = vrot.lane.b32.xlu0 %v1085_v48, %s1135_s13 }
 0x44f   :  { %729 = vrot.lane.b32.xlu2 %v1314_v28, %s1135_s13 }
 0x490   :  { %v673_v49 = vpop.xlane.xlu1 %672 }
 0x491   :  { %1115 = vrcp.f32 %v673_v49 }
 0x497   :  { %v1116_v52 = vpop.eup %1115 }
 0x498   :  { %v687_v57 = vmul.f32 %v1116_v52, %v673_v49 }
 0x49a   :  { %v691_v59 = vsub.f32 2.0, %v687_v57 }
 0x49c   :  { %v695_v11 = vmul.f32 %v1116_v52, %v691_v59 }
 0x49e   :  { %v699_v6 = vmul.f32 %v1108_v21, %v695_v11 }
 0x4a2   :  { %v676_v50 = vpop.xlane.xlu2 %675 }
 0x4a3   :  { %1117 = vrcp.f32 %v676_v50  ;;  %v682_v51 = vpop.xlane.xlu0 %681 }
 0x4a4   :  { %1119 = vrcp.f32 %v682_v51 }
 0x4a8   :  { %v756_v53 = vpop.permute.xlu1 %755 }
 0x4a9   :  { %v1118_v54 = vpop.eup %1117  ;;  %776 = vmatpush.msrb.mxu2 %v756_v53 }
 0x4aa   :  { %v1120_v31 = vpop.eup %1119  ;;  %v688_v55 = vmul.f32 %v1118_v54, %v676_v50  ;;  %v679_v56 = vpop.xlane.xlu2 %678 }
 0x4ab   :  { %1121 = vrcp.f32 %v679_v56  ;;  %v690_v29 = vmul.f32 %v1120_v31, %v682_v51 }
 0x4ac   :  { %v692_v58 = vsub.f32 2.0, %v688_v55  ;;  %1123 = vrcp.f32 %v1136_v24 }
 0x4ad   :  { %v694_v28 = vsub.f32 2.0, %v690_v29  ;;  %v961_v29 = vld [vmem:[%s1532_s6 + $0x18] sm:$0xff] }
 0x4ae   :  { %v696_v34 = vmul.f32 %v1118_v54, %v692_v58 }
 0x4af   :  { %v698_v25 = vmul.f32 %v1120_v31, %v694_v28  ;;  %v959_v28 = vld [vmem:[%s1532_s6 + $0x8] sm:$0xff] }
 0x4b0   :  { %v1418_v62 = vmul.f32 %v1110_v40, %v696_v34 }
 0x4b1   :  { %v1122_v60 = vpop.eup %1121  ;;  %v1422_v8 = vmul.f32 %v1112_v42, %v698_v25 }
 0x4b2   :  { %v689_v0 = vmul.f32 %v1122_v60, %v679_v56  ;;  %v730_v4 = vpop.permute.xlu2 %729  ;;  %v1124_v27 = vpop.eup %1123 }
 0x4b3   :  { %750 = vmatpush.msrb.mxu1 %v730_v4  ;;  %v858_v30 = vmul.f32 32.0, %v1124_v27  ;;  %vm862_vm2 = vweird.f32 %v1124_v27 }
 0x4b4   :  { %v693_v22 = vsub.f32 2.0, %v689_v0  ;;  %1039 = vmatmul.msk.f32.vlgmr.msrb.gmra.mxu1 %vm280_vm1, %v1418_v62 }
 0x4b6   :  { %v697_v12 = vmul.f32 %v1122_v60, %v693_v22  ;;  %v1087_v17 = vpop.permute.xlu0 %1086  ;;  %v958_v60 = vld [vmem:[%s1532_s6] sm:$0xff] }
 0x4b7   :  { %v1089_v7 = vunpack.i.h.bf16 %v1087_v17  ;;  %v1088_v26 = vunpack.i.l.bf16 %v1087_v17 }
 0x4b8   :  { %v701_v9 = vmul.f32 %v1114_v46, %v697_v12 }
 0x4b9   :  { %724 = vmatpush.msra.mxu0 %v1088_v26  ;;  %802 = vmatpush.msrb.mxu3 %v1089_v7 }
 0x4ba   :  { %1038 = vmatmul.msk.f32.vlgmr.msra.gmra.mxu0 %vm280_vm1, %v699_v6  ;;  %1041 = vmatmul.msk.f32.vlgmr.msrb.gmra.mxu3 %vm280_vm1, %v1422_v8 }
 0x4bb   :  { %1040 = vmatmul.msk.f32.vlgmr.msrb.gmra.mxu2 %vm280_vm1, %v701_v9  ;;  %984 = vmatpush.msrb.mxu0 %v961_v29 }
 0x531   :  { %v752_v10 = vpop.f32.mrf.mxu1 }
 0x532   :  { %v808_v1 = vadd.f32 %v752_v10, %v1388_v63 }
 0x534   :  { %v848_v3 = vsel %vm47_vm0, %v808_v1, 0.0 }
 0x535   :  { %849 = vadd.xlane.f32.xlu2 %v848_v3 }
 0x537   :  { %v726_v5 = vpop.f32.mrf.mxu0 }
 0x538   :  { %v807_v13 = vadd.f32 %v726_v5, %v1383_v61  ;;  %v859_v61 = vsub.f32 1.0, %v858_v30 }
 0x53a   :  { %v845_v15 = vsel %vm47_vm0, %v807_v13, 0.0  ;;  %v860_v32 = vmul.f32 %v1124_v27, %v859_v61 }
 0x53b   :  { %846 = vadd.xlane.f32.xlu0 %v845_v15 }
 0x53c   :  { %v861_v35 = vadd.f32 %v1124_v27, %v860_v32  ;;  %v842_v32 = vld [vmem:[%s1534_s5] sm:$0x3] }
 0x53d   :  { %v804_v16 = vpop.f32.mrf.mxu3 }
 0x53e   :  { %v810_v18 = vadd.f32 %v804_v16, %v1398_v14  ;;  %v778_v19 = vpop.f32.mrf.mxu2  ;;  %v863_v36 = vsel %vm862_vm2, %v1124_v27, %v861_v35  ;;  %vm831_vm2 = vcmask 130048  }
 0x53f   :  { %v809_v20 = vadd.f32 %v778_v19, %v1391_v2 }
 0x540   :  { %v854_v63 = vsel %vm47_vm0, %v810_v18, 0.0 }
 0x541   :  { %v851_v21 = vsel %vm47_vm0, %v809_v20, 0.0 }
 0x542   :  { %852 = vadd.xlane.f32.xlu1 %v851_v21  ;;  %v839_v21 = vld [vmem:[%s1533_s4] sm:$0x3] }
 0x543   :  { %855 = vadd.xlane.f32.xlu0 %v854_v63  ;;  %v841_v30 = vrot.slane %v839_v21, 1 }
 0x5a8   :  { %v850_v37 = vpop.xlane.xlu2 %849 }
 0x5a9   :  { %v865_v14 = vmul.f32 %v863_v36, %v850_v37  ;;  %v844_v37 = vrot.slane %v842_v32, 1 }
 0x5ab   :  { %v1436_v38 = vsub.f32 %v808_v1, %v865_v14 }
 0x5ad   :  { %v873_v2 = vmul.f32 %v1436_v38, %v1436_v38 }
 0x5ae   :  { %v847_v39 = vpop.xlane.xlu0 %846 }
 0x5af   :  { %v864_v40 = vmul.f32 %v863_v36, %v847_v39  ;;  %v879_v42 = vsel %vm47_vm0, %v873_v2, 0.0 }
 0x5b0   :  { %880 = vadd.xlane.f32.xlu0 %v879_v42  ;;  %v940_v42 = vperm.slane %v839_v21, 0 }
 0x5b1   :  { %v1441_v43 = vsub.f32 %v807_v13, %v864_v40 }
 0x5b3   :  { %v872_v45 = vmul.f32 %v1441_v43, %v1441_v43 }
 0x5b5   :  { %v853_v46 = vpop.xlane.xlu1 %852  ;;  %v876_v47 = vsel %vm47_vm0, %v872_v45, 0.0  ;;  %v941_v45 = vperm.slane %v841_v30, 0 }
 0x5b6   :  { %v866_v48 = vmul.f32 %v863_v36, %v853_v46  ;;  %v856_v49 = vpop.xlane.xlu0 %855  ;;  %877 = vadd.xlane.f32.xlu1 %v876_v47 }
 0x5b7   :  { %v867_v50 = vmul.f32 %v863_v36, %v856_v49  ;;  %v949_v49 = vperm.slane %v844_v37, 0 }
 0x5b8   :  { %v1446_v51 = vsub.f32 %v809_v20, %v866_v48 }
 0x5b9   :  { %v1448_v52 = vsub.f32 %v810_v18, %v867_v50 }
 0x5ba   :  { %v874_v53 = vmul.f32 %v1446_v51, %v1446_v51 }
 0x5bb   :  { %v875_v54 = vmul.f32 %v1448_v52, %v1448_v52 }
 0x5bc   :  { %v882_v31 = vsel %vm47_vm0, %v874_v53, 0.0 }
 0x5bd   :  { %883 = vadd.xlane.f32.xlu2 %v882_v31  ;;  %v885_v55 = vsel %vm47_vm0, %v875_v54, 0.0  ;;  %v948_v31 = vperm.slane %v842_v32, 0 }
 0x5be   :  { %886 = vadd.xlane.f32.xlu1 %v885_v55 }
 0x5c4   :  { %813 = vrot.lane.b32.xlu0 %v1374_v44, %s1137_s14 }
 0x5cc   :  { %819 = vrot.lane.b32.xlu0 %v1418_v62, %s1138_s15 }
 0x5d5   :  { %811 = vrot.lane.b32.xlu2 %v1366_v33, %s1137_s14  ;;  %v960_v33 = vld [vmem:[%s1532_s6 + $0x10] sm:$0xff] }
 0x5d6   :  { %985 = vmatpush.msrb.mxu0 %v960_v33 }
 0x5d7   :  { %817 = vrot.lane.b32.xlu1 %v699_v6, %s1138_s15 }
 0x5d8   :  { %986 = vmatpush.msrb.mxu0 %v959_v28 }
 0x5da   :  { %987 = vmatpush.msrb.mxu0 %v958_v60 }
 0x5dd   :  { %823 = vrot.lane.b32.xlu2 %v701_v9, %s1139_s16 }
 0x5df   :  { %825 = vrot.lane.b32.xlu1 %v1422_v8, %s1139_s16 }
 0x623   :  { %v881_v56 = vpop.xlane.xlu0 %880 }
 0x624   :  { %v889_v57 = vmul.f32 %v881_v56, %v863_v36 }
 0x626   :  { %v1460_v58 = vadd.f32 1e-05, %v889_v57 }
 0x628   :  { %1125 = vrsqrt.f32 %v1460_v58  ;;  %vm912_vm12 = vweird.f32 %v1460_v58 }
 0x629   :  { %v878_v34 = vpop.xlane.xlu1 %877 }
 0x62a   :  { %v888_v44 = vmul.f32 %v878_v34, %v863_v36 }
 0x62c   :  { %v892_v59 = vadd.f32 1e-05, %v888_v44 }
 0x62e   :  { %1127 = vrsqrt.f32 %v892_v59  ;;  %v1475_v0 = vpop.eup %1125  ;;  %vm902_vm4 = vweird.f32 %v892_v59 }
 0x62f   :  { %v907_v17 = vmul.f32 %v1475_v0, %v1460_v58  ;;  %vm913_vm8 = vweird.f32 %v1475_v0 }
 0x630   :  { %v884_v62 = vpop.xlane.xlu2 %883  ;;  %vm1490_vm14 = vmor %vm912_vm12, %vm913_vm8 }
 0x631   :  { %v890_v4 = vmul.f32 %v884_v62, %v863_v36  ;;  %v887_v11 = vpop.xlane.xlu1 %886  ;;  %v908_v8 = vmul.f32 %v1475_v0, %v907_v17 }
 0x632   :  { %v891_v25 = vmul.f32 %v887_v11, %v863_v36 }
 0x633   :  { %v894_v22 = vadd.f32 1e-05, %v890_v4  ;;  %v909_v5 = vmul.f32 0.5, %v908_v8 }
 0x634   :  { %v1128_v12 = vpop.eup %1127  ;;  %v895_v7 = vadd.f32 1e-05, %v891_v25 }
 0x635   :  { %v897_v26 = vmul.f32 %v1128_v12, %v892_v59  ;;  %1129 = vrsqrt.f32 %v894_v22  ;;  %vm903_vm3 = vweird.f32 %v1128_v12  ;;  %v910_v20 = vsub.f32 1.5, %v909_v5 }
 0x636   :  { %1131 = vrsqrt.f32 %v895_v7  ;;  %vm904_vm5 = vmor %vm902_vm4, %vm903_vm3  ;;  %vm922_vm9 = vweird.f32 %v894_v22  ;;  %v814_v40 = vpop.permute.xlu0 %813  ;;  %vm932_vm11 = vweird.f32 %v895_v7 }
 0x637   :  { %v898_v6 = vmul.f32 %v1128_v12, %v897_v26  ;;  %v911_v2 = vmul.f32 %v1475_v0, %v910_v20  ;;  %v830_v62 = vsel %vm280_vm1, %v1370_v41, %v814_v40 }
 0x638   :  { %v812_v27 = vpop.permute.xlu2 %811 }
 0x639   :  { %v899_v9 = vmul.f32 0.5, %v898_v6  ;;  %v915_v54 = vsel %vm1490_vm14, %v1475_v0, %v911_v2  ;;  %v829_v57 = vsel %vm280_vm1, %v1362_v23, %v812_v27  ;;  %vm995_vm1 = vcmask 31744  }
 0x63b   :  { %v1130_v10 = vpop.eup %1129  ;;  %v900_v1 = vsub.f32 1.5, %v899_v9 }
 0x63c   :  { %v1132_v3 = vpop.eup %1131  ;;  %v917_v13 = vmul.f32 %v1130_v10, %v894_v22  ;;  %vm923_vm6 = vweird.f32 %v1130_v10 }
 0x63d   :  { %v901_v15 = vmul.f32 %v1128_v12, %v900_v1  ;;  %v927_v16 = vmul.f32 %v1132_v3, %v895_v7  ;;  %vm933_vm7 = vweird.f32 %v1132_v3  ;;  %vm924_vm10 = vmor %vm922_vm9, %vm923_vm6 }
 0x63e   :  { %v918_v18 = vmul.f32 %v1130_v10, %v917_v13  ;;  %vm934_vm13 = vmor %vm932_vm11, %vm933_vm7  ;;  %v820_v60 = vpop.permute.xlu0 %819 }
 0x63f   :  { %v928_v19 = vmul.f32 %v1132_v3, %v927_v16  ;;  %v905_v63 = vsel %vm904_vm5, %v1128_v12, %v901_v15  ;;  %v1090_v12 = vld [vmem:[%s1531_s7] ss:$0 sm:$0xff] }
 0x640   :  { %v919_v24 = vmul.f32 0.5, %v918_v18  ;;  %v936_v36 = vmul.f32 %v905_v63, %v1441_v43  ;;  %v824_v29 = vpop.permute.xlu2 %823 }
 0x641   :  { %v929_v61 = vmul.f32 0.5, %v928_v19 }
 0x642   :  { %v920_v35 = vsub.f32 1.5, %v919_v24  ;;  %v944_v48 = vmul.f32 %v940_v42, %v936_v36 }
 0x643   :  { %v930_v14 = vsub.f32 1.5, %v929_v61 }
 0x644   :  { %v921_v39 = vmul.f32 %v1130_v10, %v920_v35  ;;  %v952_v44 = vadd.f32 %v948_v31, %v944_v48 }
 0x645   :  { %v931_v46 = vmul.f32 %v1132_v3, %v930_v14 }
 0x646   :  { %v925_v47 = vsel %vm924_vm10, %v1130_v10, %v921_v39 }
 0x647   :  { %v938_v50 = vmul.f32 %v925_v47, %v1446_v51  ;;  %v935_v53 = vsel %vm934_vm13, %v1132_v3, %v931_v46  ;;  %v937_v51 = vmul.f32 %v915_v54, %v1436_v38  ;;  %v833_v38 = vsel %vm831_vm2, %v830_v62, %v820_v60 }
 0x648   :  { %v939_v56 = vmul.f32 %v935_v53, %v1448_v52 }
 0x649   :  { %v946_v55 = vmul.f32 %v941_v45, %v938_v50  ;;  %v818_v58 = vpop.permute.xlu1 %817  ;;  %v945_v23 = vmul.f32 %v940_v42, %v937_v51 }
 0x64a   :  { %v832_v34 = vsel %vm831_vm2, %v829_v57, %v818_v58  ;;  %v947_v28 = vmul.f32 %v941_v45, %v939_v56 }
 0x64b   :  { %v954_v33 = vadd.f32 %v949_v49, %v946_v55  ;;  %v835_v59 = vsel %vm834_vm15, %v832_v34, %v824_v29  ;;  %v953_v25 = vadd.f32 %v948_v31, %v945_v23 }
 0x64c   :  { %837 = vst.msk [vmem:[%s1535_s9] sm:$0xff] %vm47_vm0, %v835_v59  ;;  %v955_v4 = vadd.f32 %v949_v49, %v947_v28 }
 0x64d   :  { %v956_v52 = vadd.f32 %v954_v33, %v952_v44 }
 0x64e   :  { %v957_v22 = vadd.f32 %v955_v4, %v953_v25 }
 0x64f   :  { %1042 = vmatmul.msk.f32.vlgmr.msrb.gmra.mxu0 %vm47_vm0, %v956_v52 }
 0x651   :  { %v826_v0 = vpop.permute.xlu1 %825 }
 0x652   :  { %v836_v11 = vsel %vm834_vm15, %v833_v38, %v826_v0 }
 0x653   :  { %838 = vst.msk [vmem:[%s1535_s9 + $0x8] sm:$0xff] %vm47_vm0, %v836_v11 }
 0x657   :  { %1043 = vmatmul.msk.f32.gmra.mxu0 %vm47_vm0, %v957_v22 }
 0x6cc   :  { %v989_v41 = vpop.f32.mrf.mxu0 }
 0x6cd   :  { %v990_v17 = vadd.f32 %v1090_v12, %v989_v41 }
 0x6cf   :  { %996 = vst.msk [vmem:[%s1536_s8] sm:$0xff] %vm995_vm1, %v990_v17 }
 0x6d4   :  { %v992_v7 = vpop.f32.mrf.mxu0 }
 0x6d5   :  { %v993_v26 = vadd.f32 %v1090_v12, %v992_v7 }
 0x6d7   :  { %997 = vst.msk [vmem:[%s1536_s8 + $0x8] sm:$0xff] %vm995_vm1, %v993_v26 }

</bundles_post_ra>
